<compile_context>
chip_gen: v7x
topology: tpu7x:2x2x1
jax: 0.10.0
libtpu: 0.0.40
codegen_flags: <defaults>
</compile_context>

<pallas_src>
import functools

import jax
import jax.numpy as jnp
from jax.experimental import pallas as pl
from jax.experimental.pallas import tpu as pltpu


def _cosine_sim_kernel(left_ref, right_ref, out_ref, *, normalize: bool):
    # left_ref/right_ref: (row_tile, D) tiles in VMEM; out_ref: (1, row_tile).
    # Cast up-front to f32 for exact parity with the reference; on v6e/v7x the
    # bf16 VPU could keep products in bf16, but accumulation stays f32 anyway.
    l = left_ref[...].astype(jnp.float32)
    r = right_ref[...].astype(jnp.float32)

    # Lane-axis reduction for the per-row dot product.
    dot = jnp.sum(l * r, axis=1, keepdims=True)            # (row_tile, 1)

    if normalize:
        # F.normalize: x / max(||x||_2, eps), eps = 1e-12, so
        #   cos = dot * rsqrt(max(l.l, eps^2)) * rsqrt(max(r.r, eps^2))
        eps_sq = jnp.float32(1e-24)
        ll = jnp.sum(l * l, axis=1, keepdims=True)          # (row_tile, 1)
        rr = jnp.sum(r * r, axis=1, keepdims=True)          # (row_tile, 1)
        inv = jax.lax.rsqrt(jnp.maximum(ll, eps_sq)) * jax.lax.rsqrt(
            jnp.maximum(rr, eps_sq))
        cos = dot * inv
    else:
        cos = dot

    prob = (cos + 1.0) * 0.5                                # (row_tile, 1)
    # Lane-dense store: (row_tile, 1) column -> (1, row_tile) row (XLU has
    # plenty of slack in this mem-bound kernel).
    out_ref[...] = jnp.transpose(prob).astype(out_ref.dtype)


def _pick_row_tile(n, d, itemsize, vmem_input_budget=32 << 20):
    """Largest 128-multiple row tile whose double-buffered inputs fit budget."""
    per_row_bytes = 4 * d * itemsize      # 2 operands x 2 pipeline buffers
    max_rows = max(vmem_input_budget // max(per_row_bytes, 1), 128)
    tile = max(128, min(2048, (max_rows // 128) * 128))
    # Never tile wider than the (128-padded) problem itself.
    n_pad_min = ((n + 127) // 128) * 128
    return min(tile, n_pad_min)


def cosine_similarity_decoder(left_embeddings, right_embeddings,
                              normalize=True, row_tile=None):
    """Pallas TPU implementation of CosineSimilarityDecoder.forward.

    left_embeddings, right_embeddings: (N, D) arrays.
    Returns: (N,) float32 array of probabilities in [0, 1].
    """
    assert left_embeddings.shape == right_embeddings.shape
    n, d = left_embeddings.shape
    itemsize = jnp.dtype(left_embeddings.dtype).itemsize

    if row_tile is None:
        row_tile = _pick_row_tile(n, d, itemsize)
    assert row_tile % 128 == 0, "row_tile must be a multiple of 128"

    # Pad N up to a multiple of row_tile so every grid step is full-size
    # (supports arbitrary N; padded rows are dropped after the call).
    n_pad = ((n + row_tile - 1) // row_tile) * row_tile
    if n_pad != n:
        pad = ((0, n_pad - n), (0, 0))
        left_embeddings = jnp.pad(left_embeddings, pad)
        right_embeddings = jnp.pad(right_embeddings, pad)

    # Scoped VMEM: 2 inputs x 2 buffers + tiny output rows + headroom.
    per_buf = row_tile * d * itemsize
    vmem_limit = int(min(64 << 20, max(16 << 20, 4 * per_buf + (8 << 20))))

    kernel = functools.partial(_cosine_sim_kernel, normalize=normalize)

    out = pl.pallas_call(
        kernel,
        out_shape=jax.ShapeDtypeStruct((1, n_pad), jnp.float32),
        grid_spec=pltpu.PrefetchScalarGridSpec(
            num_scalar_prefetch=0,
            grid=(n_pad // row_tile,),
            in_specs=[
                pl.BlockSpec((row_tile, d), lambda i: (i, 0)),
                pl.BlockSpec((row_tile, d), lambda i: (i, 0)),
            ],
            out_specs=pl.BlockSpec((1, row_tile), lambda i: (0, i)),
        ),
        compiler_params=pltpu.CompilerParams(
            dimension_semantics=("parallel",),
            vmem_limit_bytes=vmem_limit,
        ),
    )(left_embeddings, right_embeddings)

    # PyTorch returns shape (N,) after the dim=1 reduction.
    return out[0, :n]


def _reference(left, right, normalize=True):
    l = jnp.asarray(left, jnp.float32)
    r = jnp.asarray(right, jnp.float32)
    if normalize:
        eps = 1e-12
        l = l / jnp.maximum(jnp.linalg.norm(l, axis=1, keepdims=True), eps)
        r = r / jnp.maximum(jnp.linalg.norm(r, axis=1, keepdims=True), eps)
    cos = jnp.sum(l * r, axis=1)
    return (cos + 1.0) / 2.0


if __name__ == "__main__":
    key = jax.random.PRNGKey(0)
    k1, k2 = jax.random.split(key)

    N, D = 8, 32  # small demo shapes: 8 pairs, 32-dim embeddings
    left = jax.random.normal(k1, (N, D), dtype=jnp.float32)
    right = jax.random.normal(k2, (N, D), dtype=jnp.float32)

    # normalize=True path
    prob = cosine_similarity_decoder(left, right, normalize=True)
    prob = jax.block_until_ready(prob)
    ref = _reference(left, right, normalize=True)
    assert prob.shape == (N,)
    assert jnp.allclose(prob, ref, atol=1e-5, rtol=1e-5), (prob, ref)

    # normalize=False path
    prob_nn = cosine_similarity_decoder(left, right, normalize=False)
    prob_nn = jax.block_until_ready(prob_nn)
    ref_nn = _reference(left, right, normalize=False)
    assert prob_nn.shape == (N,)
    assert jnp.allclose(prob_nn, ref_nn, atol=1e-5, rtol=1e-5), (prob_nn, ref_nn)

    print("KERNEL_OK")
</pallas_src>

<mosaic_0001>
module attributes {stable_mosaic.version = 11 : i64} {
  func.func @_cosine_sim_kernel(%arg0: i32, %arg1: memref<128x32xf32, #tpu.memory_space<vmem>>, %arg2: memref<128x32xf32, #tpu.memory_space<vmem>>, %arg3: memref<1x128xf32, #tpu.memory_space<vmem>>) attributes {dimension_semantics = [#tpu.dimension_semantics<parallel>], iteration_bounds = array<i64: 1>, scalar_prefetch = 0 : i64, scratch_operands = 0 : i64, tpu.core_type = #tpu.core_type<tc>, window_params = [{transform_indices = @transform_0, window_bounds = array<i64: 128, 32>}, {transform_indices = @transform_1, window_bounds = array<i64: 128, 32>}, {transform_indices = @transform_2, window_bounds = array<i64: 1, 128>}]} {
    %c0 = arith.constant 0 : index
    %c0_0 = arith.constant 0 : index
    %0 = vector.load %arg1[%c0, %c0_0] : memref<128x32xf32, #tpu.memory_space<vmem>>, vector<128x32xf32>
    %c0_1 = arith.constant 0 : index
    %c0_2 = arith.constant 0 : index
    %1 = vector.load %arg2[%c0_1, %c0_2] : memref<128x32xf32, #tpu.memory_space<vmem>>, vector<128x32xf32>
    %2 = arith.mulf %0, %1 : vector<128x32xf32>
    %cst = arith.constant dense<0.000000e+00> : vector<128xf32>
    %3 = vector.multi_reduction <add>, %2, %cst [1] : vector<128x32xf32> to vector<128xf32>
    %4 = vector.shape_cast %3 : vector<128xf32> to vector<128x1xf32>
    %5 = arith.mulf %0, %0 : vector<128x32xf32>
    %cst_3 = arith.constant dense<0.000000e+00> : vector<128xf32>
    %6 = vector.multi_reduction <add>, %5, %cst_3 [1] : vector<128x32xf32> to vector<128xf32>
    %7 = vector.shape_cast %6 : vector<128xf32> to vector<128x1xf32>
    %8 = arith.mulf %1, %1 : vector<128x32xf32>
    %cst_4 = arith.constant dense<0.000000e+00> : vector<128xf32>
    %9 = vector.multi_reduction <add>, %8, %cst_4 [1] : vector<128x32xf32> to vector<128xf32>
    %10 = vector.shape_cast %9 : vector<128xf32> to vector<128x1xf32>
    %cst_5 = arith.constant 1.000000e-24 : f32
    %11 = vector.broadcast %cst_5 : f32 to vector<128x1xf32>
    %12 = arith.maximumf %7, %11 : vector<128x1xf32>
    %13 = math.rsqrt %12 : vector<128x1xf32>
    %cst_6 = arith.constant 1.000000e-24 : f32
    %14 = vector.broadcast %cst_6 : f32 to vector<128x1xf32>
    %15 = arith.maximumf %10, %14 : vector<128x1xf32>
    %16 = math.rsqrt %15 : vector<128x1xf32>
    %17 = arith.mulf %13, %16 : vector<128x1xf32>
    %18 = arith.mulf %4, %17 : vector<128x1xf32>
    %cst_7 = arith.constant 1.000000e+00 : f32
    %19 = vector.broadcast %cst_7 : f32 to vector<128x1xf32>
    %20 = arith.addf %18, %19 : vector<128x1xf32>
    %cst_8 = arith.constant 5.000000e-01 : f32
    %21 = vector.broadcast %cst_8 : f32 to vector<128x1xf32>
    %22 = arith.mulf %20, %21 : vector<128x1xf32>
    %23 = tpu.transpose %22, [1, 0] : vector<128x1xf32> -> vector<1x128xf32>
    %c0_9 = arith.constant 0 : index
    %c0_10 = arith.constant 0 : index
    %24 = vector.load %arg3[%c0_9, %c0_10] : memref<1x128xf32, #tpu.memory_space<vmem>>, vector<1x128xf32>
    tpu.vector_store %arg3[%c0_9, %c0_10], %23 {strides = array<i32>} : memref<1x128xf32, #tpu.memory_space<vmem>>, vector<1x128xf32>,
    return
  }
  func.func @transform_0(%arg0: i32) -> (i32, i32) {
    %c0_i32 = arith.constant 0 : i32
    %c0_i32_0 = arith.constant 0 : i32
    return %arg0, %c0_i32 : i32, i32
  }
  func.func @transform_1(%arg0: i32) -> (i32, i32) {
    %c0_i32 = arith.constant 0 : i32
    %c0_i32_0 = arith.constant 0 : i32
    return %arg0, %c0_i32 : i32, i32
  }
  func.func @transform_2(%arg0: i32) -> (i32, i32) {
    %c0_i32 = arith.constant 0 : i32
    %c0_i32_0 = arith.constant 0 : i32
    return %c0_i32, %arg0 : i32, i32
  }
}

</mosaic_0001>

<bundles_post_ra>
// kernel: tpu_custom_call.1
= control target key start
LH: loop header
LB: loop body
LE: loop exit
PB: predicated region body
PF: predicated region fallthrough
CT: control target
= control target key end

     0   :  { %vm60_vm0 = vcmask 261120   ;;  %s796_s0 = inlined_call_operand.vmem [shape: f32[128,32], index: 0, kind: input, shape index: {}]   ;;  %s797_s1 = inlined_call_operand.vmem [shape: f32[128,32], index: 1, kind: input, shape index: {}]   ;;  %s798_s2 = inlined_call_operand.hbm [shape: f32[1,128], index: 2, kind: output, shape index: {}]  }
   0x1   :  { %v520_v0 = vld [vmem:[%s796_s0 + $0x8] sm:$0xff]  ;;  %v525_v1 = vld [vmem:[%s796_s0] sm:$0xff]  ;;  %v544_v8 = vld [vmem:[%s797_s1 + $0x10] sm:$0xff] }
   0x2   :  { %v530_v2 = vld [vmem:[%s797_s1 + $0x8] sm:$0xff]  ;;  %v110_v3 = vmul.f32 %v520_v0, %v520_v0  ;;  %v109_v4 = vmul.f32 %v525_v1, %v525_v1  ;;  %v28_v6 = vld [vmem:[%s797_s1] sm:$0xff]  ;;  %v549_v9 = vld [vmem:[%s796_s0 + $0x10] sm:$0xff]  ;;  %v175_v14 = vmul.f32 %v544_v8, %v544_v8 }
   0x3   :  { %v174_v5 = vmul.f32 %v530_v2, %v530_v2  ;;  %v173_v7 = vmul.f32 %v28_v6, %v28_v6  ;;  %v111_v15 = vmul.f32 %v549_v9, %v549_v9  ;;  %v562_v16 = vld [vmem:[%s797_s1 + $0x18] sm:$0xff]  ;;  %v578_v22 = vld [vmem:[%s797_s1 + $0x20] sm:$0xff] }
   0x4   :  { %v128_v10 = vsel %vm60_vm0, %v110_v3, 0.0  ;;  %v125_v11 = vsel %vm60_vm0, %v109_v4, 0.0  ;;  %v567_v17 = vld [vmem:[%s796_s0 + $0x18] sm:$0xff]  ;;  %v195_v18 = vsel %vm60_vm0, %v175_v14, 0.0  ;;  %v176_v20 = vmul.f32 %v562_v16, %v562_v16  ;;  %v583_v23 = vld [vmem:[%s796_s0 + $0x20] sm:$0xff] }
   0x5   :  { %129 = vadd.xlane.f32.xlu1 %v128_v10  ;;  %126 = vadd.xlane.f32.xlu0 %v125_v11  ;;  %v192_v12 = vsel %vm60_vm0, %v174_v5, 0.0  ;;  %v189_v13 = vsel %vm60_vm0, %v173_v7, 0.0  ;;  %v131_v19 = vsel %vm60_vm0, %v111_v15, 0.0  ;;  %v112_v21 = vmul.f32 %v567_v17, %v567_v17 }
   0x9   :  { %193 = vadd.xlane.f32.xlu1 %v192_v12  ;;  %190 = vadd.xlane.f32.xlu0 %v189_v13 }
   0xa   :  { %7 = vsyncpa [#allocation3], 0  ;;  %v198_v24 = vsel %vm60_vm0, %v176_v20, 0.0  ;;  %v134_v25 = vsel %vm60_vm0, %v112_v21, 0.0  ;;  %v177_v26 = vmul.f32 %v578_v22, %v578_v22  ;;  %v113_v27 = vmul.f32 %v583_v23, %v583_v23  ;;  %v594_v28 = vld [vmem:[%s797_s1 + $0x28] sm:$0xff]  ;;  %v610_v34 = vld [vmem:[%s797_s1 + $0x30] sm:$0xff] }
   0xb   :  { %v599_v29 = vld [vmem:[%s796_s0 + $0x28] sm:$0xff]  ;;  %v178_v32 = vmul.f32 %v594_v28, %v594_v28  ;;  %v615_v35 = vld [vmem:[%s796_s0 + $0x30] sm:$0xff]  ;;  %v179_v38 = vmul.f32 %v610_v34, %v610_v34  ;;  %v626_v40 = vld [vmem:[%s797_s1 + $0x38] sm:$0xff]  ;;  %v44_v50 = vmul.f32 %v28_v6, %v525_v1  ;;  %v45_v54 = vmul.f32 %v530_v2, %v520_v0 }
   0xc   :  { %v201_v30 = vsel %vm60_vm0, %v177_v26, 0.0  ;;  %v137_v31 = vsel %vm60_vm0, %v113_v27, 0.0  ;;  %v114_v33 = vmul.f32 %v599_v29, %v599_v29  ;;  %v115_v39 = vmul.f32 %v615_v35, %v615_v35  ;;  %v631_v41 = vld [vmem:[%s796_s0 + $0x38] sm:$0xff]  ;;  %v642_v46 = vld [vmem:[%s796_s0 + $0x40] sm:$0xff]  ;;  %v663_v56 = vld [vmem:[%s797_s1 + $0x48] sm:$0xff] }
   0xd   :  { %196 = vadd.xlane.f32.xlu1 %v195_v18  ;;  %132 = vadd.xlane.f32.xlu0 %v131_v19  ;;  %v204_v36 = vsel %vm60_vm0, %v178_v32, 0.0  ;;  %v207_v42 = vsel %vm60_vm0, %v179_v38, 0.0  ;;  %v180_v44 = vmul.f32 %v626_v40, %v626_v40  ;;  %v116_v45 = vmul.f32 %v631_v41, %v631_v41  ;;  %v652_v51 = vld [vmem:[%s797_s1 + $0x40] sm:$0xff]  ;;  %v668_v57 = vld [vmem:[%s796_s0 + $0x48] sm:$0xff]  ;;  %v679_v62 = vld [vmem:[%s796_s0 + $0x50] sm:$0xff] }
   0xe   :  { %v140_v37 = vsel %vm60_vm0, %v114_v33, 0.0  ;;  %v143_v43 = vsel %vm60_vm0, %v115_v39, 0.0  ;;  %v117_v49 = vmul.f32 %v642_v46, %v642_v46  ;;  %v61_v53 = vsel %vm60_vm0, %v44_v50, 0.0  ;;  %v690_v3 = vld [vmem:[%s797_s1 + $0x50] sm:$0xff]  ;;  %v24_v14 = vld [vmem:[%s796_s0 + $0x60] sm:$0xff]  ;;  %v41_v26 = vld [vmem:[%s797_s1 + $0x68] sm:$0xff] }
   0xf   :  { %v210_v47 = vsel %vm60_vm0, %v180_v44, 0.0  ;;  %v146_v48 = vsel %vm60_vm0, %v116_v45, 0.0  ;;  %v181_v55 = vmul.f32 %v652_v51, %v652_v51  ;;  %v64_v58 = vsel %vm60_vm0, %v45_v54, 0.0  ;;  %v40_v19 = vld [vmem:[%s797_s1 + $0x60] sm:$0xff]  ;;  %v43_v44 = vld [vmem:[%s797_s1 + $0x78] sm:$0xff] }
  0x10   :  { %v149_v52 = vsel %vm60_vm0, %v117_v49, 0.0  ;;  %v182_v60 = vmul.f32 %v663_v56, %v663_v56  ;;  %v118_v61 = vmul.f32 %v668_v57, %v668_v57  ;;  %v119_v1 = vmul.f32 %v679_v62, %v679_v62 }
  0x11   :  { %199 = vadd.xlane.f32.xlu1 %v198_v24  ;;  %135 = vadd.xlane.f32.xlu0 %v134_v25  ;;  %v213_v59 = vsel %vm60_vm0, %v181_v55, 0.0  ;;  %v46_v2 = vmul.f32 %v544_v8, %v549_v9  ;;  %v47_v6 = vmul.f32 %v562_v16, %v567_v17  ;;  %v183_v7 = vmul.f32 %v690_v3, %v690_v3  ;;  %v39_v8 = vld [vmem:[%s797_s1 + $0x58] sm:$0xff] }
  0x12   :  { %v216_v63 = vsel %vm60_vm0, %v182_v60, 0.0  ;;  %v152_v0 = vsel %vm60_vm0, %v118_v61, 0.0  ;;  %v155_v4 = vsel %vm60_vm0, %v119_v1, 0.0  ;;  %v23_v9 = vld [vmem:[%s796_s0 + $0x58] sm:$0xff]  ;;  %v184_v12 = vmul.f32 %v39_v8, %v39_v8 }
  0x13   :  { %v67_v5 = vsel %vm60_vm0, %v46_v2, 0.0  ;;  %v70_v10 = vsel %vm60_vm0, %v47_v6, 0.0  ;;  %v219_v11 = vsel %vm60_vm0, %v183_v7, 0.0  ;;  %v120_v13 = vmul.f32 %v23_v9, %v23_v9 }
  0x14   :  { %v222_v15 = vsel %vm60_vm0, %v184_v12, 0.0  ;;  %v121_v17 = vmul.f32 %v24_v14, %v24_v14  ;;  %v48_v18 = vmul.f32 %v578_v22, %v583_v23  ;;  %v49_v24 = vmul.f32 %v594_v28, %v599_v29  ;;  %v25_v22 = vld [vmem:[%s796_s0 + $0x68] sm:$0xff]  ;;  %v26_v28 = vld [vmem:[%s796_s0 + $0x70] sm:$0xff] }
  0x15   :  { %202 = vadd.xlane.f32.xlu1 %v201_v30  ;;  %138 = vadd.xlane.f32.xlu0 %v137_v31  ;;  %v158_v16 = vsel %vm60_vm0, %v120_v13, 0.0  ;;  %v185_v25 = vmul.f32 %v40_v19, %v40_v19  ;;  %v186_v30 = vmul.f32 %v41_v26, %v41_v26  ;;  %v122_v31 = vmul.f32 %v25_v22, %v25_v22 }
  0x16   :  { %v161_v20 = vsel %vm60_vm0, %v121_v17, 0.0  ;;  %v73_v21 = vsel %vm60_vm0, %v48_v18, 0.0  ;;  %v76_v23 = vsel %vm60_vm0, %v49_v24, 0.0  ;;  %v123_v33 = vmul.f32 %v26_v28, %v26_v28 }
  0x17   :  { %v225_v27 = vsel %vm60_vm0, %v185_v25, 0.0  ;;  %v228_v29 = vsel %vm60_vm0, %v186_v30, 0.0  ;;  %v164_v32 = vsel %vm60_vm0, %v122_v31, 0.0  ;;  %v53_v49 = vmul.f32 %v663_v56, %v668_v57 }
  0x18   :  { %v167_v38 = vsel %vm60_vm0, %v123_v33, 0.0  ;;  %v52_v50 = vmul.f32 %v652_v51, %v642_v46  ;;  %v55_v54 = vmul.f32 %v39_v8, %v23_v9  ;;  %v54_v55 = vmul.f32 %v690_v3, %v679_v62 }
  0x19   :  { %205 = vadd.xlane.f32.xlu1 %v204_v36  ;;  %141 = vadd.xlane.f32.xlu0 %v140_v37  ;;  %v50_v36 = vmul.f32 %v610_v34, %v615_v35  ;;  %v42_v37 = vld [vmem:[%s797_s1 + $0x70] sm:$0xff]  ;;  %v27_v34 = vld [vmem:[%s796_s0 + $0x78] sm:$0xff]  ;;  %v57_v56 = vmul.f32 %v41_v26, %v25_v22  ;;  %v56_v57 = vmul.f32 %v40_v19, %v24_v14  ;;  %s501_s0 = smov [#allocation2]  }
  0x1a   :  { %v59_v60 = vmul.f32 %v43_v44, %v27_v34  ;;  %v58_v61 = vmul.f32 %v42_v37, %v26_v28  ;;  %s404_s1 = sshll.u32 %s501_s0, 4  ;;  %s405_s1 = int_to_ptr.vmem [resolvable:$true] %s404_s1 }
  0x1b   :  { %v79_v39 = vsel %vm60_vm0, %v50_v36, 0.0  ;;  %v100_v46 = vsel %vm60_vm0, %v57_v56, 0.0  ;;  %v97_v51 = vsel %vm60_vm0, %v56_v57, 0.0  ;;  %s477_s17 = scalar_lea.vmem %s405_s1, 16  ;;  %s481_s18 = scalar_lea.vmem %s405_s1, 32 }
  0x1c   :  { %v106_v62 = vsel %vm60_vm0, %v59_v60, 0.0  ;;  %p478_p0 = scmp.ne.s32.totalorder %s405_s1, %s477_s17  ;;  %p482_p1 = scmp.lt.s32.totalorder %s405_s1, %s405_s1 }
  0x1d   :  { %208 = vadd.xlane.f32.xlu1 %v207_v42  ;;  %144 = vadd.xlane.f32.xlu0 %v143_v43  ;;  %v51_v42 = vmul.f32 %v626_v40, %v631_v41  ;;  %v187_v43 = vmul.f32 %v42_v37, %v42_v37  ;;  %p483_p2 = scmp.lt.s32.totalorder %s481_s18, %s477_s17 }
  0x1f   :  { %v82_v35 = vsel %vm60_vm0, %v51_v42, 0.0  ;;  %v231_v45 = vsel %vm60_vm0, %v187_v43, 0.0  ;;  %p484_p3 = por %p483_p2, %p482_p1 }
  0x21   :  { %211 = vadd.xlane.f32.xlu1 %v210_v47  ;;  %147 = vadd.xlane.f32.xlu0 %v146_v48  ;;  %v188_v47 = vmul.f32 %v43_v44, %v43_v44  ;;  %v124_v48 = vmul.f32 %v27_v34, %v27_v34  ;;  %p485_p4 = pnand %p484_p3, %p478_p0 }
  0x23   :  { %v234_v40 = vsel %vm60_vm0, %v188_v47, 0.0  ;;  %v170_v41 = vsel %vm60_vm0, %v124_v48, 0.0 }
  0x25   :  { %150 = vadd.xlane.f32.xlu1 %v149_v52  ;;  %62 = vadd.xlane.f32.xlu0 %v61_v53  ;;  %v88_v52 = vsel %vm60_vm0, %v53_v49, 0.0  ;;  %v85_v53 = vsel %vm60_vm0, %v52_v50, 0.0 }
  0x29   :  { %65 = vadd.xlane.f32.xlu1 %v64_v58  ;;  %214 = vadd.xlane.f32.xlu0 %v213_v59  ;;  %v94_v58 = vsel %vm60_vm0, %v55_v54, 0.0  ;;  %v91_v59 = vsel %vm60_vm0, %v54_v55, 0.0 }
  0x2d   :  { %217 = vadd.xlane.f32.xlu1 %v216_v63  ;;  %153 = vadd.xlane.f32.xlu0 %v152_v0  ;;  %v103_v63 = vsel %vm60_vm0, %v58_v61, 0.0 }
  0x31   :  { %156 = vadd.xlane.f32.xlu1 %v155_v4  ;;  %68 = vadd.xlane.f32.xlu0 %v67_v5 }
  0x35   :  { %71 = vadd.xlane.f32.xlu1 %v70_v10  ;;  %220 = vadd.xlane.f32.xlu0 %v219_v11 }
  0x39   :  { %223 = vadd.xlane.f32.xlu1 %v222_v15  ;;  %159 = vadd.xlane.f32.xlu0 %v158_v16 }
  0x3d   :  { %162 = vadd.xlane.f32.xlu1 %v161_v20  ;;  %74 = vadd.xlane.f32.xlu0 %v73_v21 }
  0x41   :  { %77 = vadd.xlane.f32.xlu1 %v76_v23  ;;  %226 = vadd.xlane.f32.xlu0 %v225_v27 }
  0x45   :  { %229 = vadd.xlane.f32.xlu1 %v228_v29  ;;  %165 = vadd.xlane.f32.xlu0 %v164_v32 }
  0x49   :  { %168 = vadd.xlane.f32.xlu1 %v167_v38  ;;  %80 = vadd.xlane.f32.xlu0 %v79_v39 }
  0x4d   :  { %83 = vadd.xlane.f32.xlu1 %v82_v35  ;;  %232 = vadd.xlane.f32.xlu0 %v231_v45 }
  0x51   :  { %235 = vadd.xlane.f32.xlu1 %v234_v40  ;;  %171 = vadd.xlane.f32.xlu0 %v170_v41 }
  0x55   :  { %89 = vadd.xlane.f32.xlu1 %v88_v52  ;;  %86 = vadd.xlane.f32.xlu0 %v85_v53 }
  0x59   :  { %95 = vadd.xlane.f32.xlu1 %v94_v58  ;;  %92 = vadd.xlane.f32.xlu0 %v91_v59 }
  0x5d   :  { %101 = vadd.xlane.f32.xlu1 %v100_v46  ;;  %98 = vadd.xlane.f32.xlu0 %v97_v51 }
  0x61   :  { %107 = vadd.xlane.f32.xlu1 %v106_v62  ;;  %104 = vadd.xlane.f32.xlu0 %v103_v63 }
  0x92   :  { %v130_v0 = vpop.xlane.xlu1 %129  ;;  %v127_v1 = vpop.xlane.xlu0 %126 }
  0x93   :  { %v237_v9 = vmax.f32 %v127_v1, 1e-24  ;;  %v238_v12 = vmax.f32 %v130_v0, 1e-24 }
  0x96   :  { %v194_v2 = vpop.xlane.xlu1 %193  ;;  %v191_v3 = vpop.xlane.xlu0 %190 }
  0x97   :  { %v269_v8 = vmax.f32 %v191_v3, 1e-24  ;;  %v270_v13 = vmax.f32 %v194_v2, 1e-24 }
  0x99   :  { %413 = vrsqrt.f32 %v269_v8 }
  0x9a   :  { %v197_v4 = vpop.xlane.xlu1 %196  ;;  %v133_v5 = vpop.xlane.xlu0 %132  ;;  %415 = vrsqrt.f32 %v237_v9 }
  0x9b   :  { %417 = vrsqrt.f32 %v238_v12  ;;  %v271_v18 = vmax.f32 %v197_v4, 1e-24  ;;  %v239_v19 = vmax.f32 %v133_v5, 1e-24 }
  0x9c   :  { %419 = vrsqrt.f32 %v270_v13 }
  0x9d   :  { %421 = vrsqrt.f32 %v271_v18 }
  0x9e   :  { %v200_v6 = vpop.xlane.xlu1 %199  ;;  %v136_v7 = vpop.xlane.xlu0 %135  ;;  %423 = vrsqrt.f32 %v239_v19 }
  0x9f   :  { %v272_v25 = vmax.f32 %v200_v6, 1e-24  ;;  %v240_v22 = vmax.f32 %v136_v7, 1e-24 }
  0xa1   :  { %425 = vrsqrt.f32 %v272_v25 }
  0xa2   :  { %v203_v10 = vpop.xlane.xlu1 %202  ;;  %v139_v11 = vpop.xlane.xlu0 %138  ;;  %427 = vrsqrt.f32 %v240_v22 }
  0xa3   :  { %v414_v20 = vpop.eup %413  ;;  %v273_v38 = vmax.f32 %v203_v10, 1e-24  ;;  %v241_v43 = vmax.f32 %v139_v11, 1e-24 }
  0xa4   :  { %v416_v26 = vpop.eup %415 }
  0xa5   :  { %v418_v23 = vpop.eup %417  ;;  %v301_v27 = vmul.f32 %v416_v26, %v414_v20  ;;  %429 = vrsqrt.f32 %v273_v38 }
  0xa6   :  { %v206_v14 = vpop.xlane.xlu1 %205  ;;  %v142_v15 = vpop.xlane.xlu0 %141  ;;  %431 = vrsqrt.f32 %v241_v43 }
  0xa7   :  { %v420_v30 = vpop.eup %419  ;;  %v274_v48 = vmax.f32 %v206_v14, 1e-24  ;;  %v242_v41 = vmax.f32 %v142_v15, 1e-24 }
  0xa8   :  { %v302_v33 = vmul.f32 %v420_v30, %v418_v23  ;;  %v422_v44 = vpop.eup %421 }
  0xa9   :  { %v424_v35 = vpop.eup %423  ;;  %433 = vrsqrt.f32 %v274_v48 }
  0xaa   :  { %v209_v16 = vpop.xlane.xlu1 %208  ;;  %v766_v17 = vpop.xlane.xlu0 %144  ;;  %v303_v50 = vmul.f32 %v424_v35, %v422_v44  ;;  %435 = vrsqrt.f32 %v242_v41 }
  0xab   :  { %v426_v49 = vpop.eup %425  ;;  %v275_v46 = vmax.f32 %v209_v16, 1e-24  ;;  %v243_v61 = vmax.f32 %v766_v17, 1e-24 }
  0xac   :  { %v428_v52 = vpop.eup %427 }
  0xad   :  { %v304_v59 = vmul.f32 %v428_v52, %v426_v49  ;;  %437 = vrsqrt.f32 %v275_v46 }
  0xae   :  { %v768_v21 = vpop.xlane.xlu1 %211  ;;  %v770_v24 = vpop.xlane.xlu0 %147  ;;  %439 = vrsqrt.f32 %v243_v61 }
  0xaf   :  { %v430_v62 = vpop.eup %429  ;;  %v276_v3 = vmax.f32 %v768_v21, 1e-24  ;;  %v244_v5 = vmax.f32 %v770_v24, 1e-24 }
  0xb0   :  { %v432_v0 = vpop.eup %431 }
  0xb1   :  { %v305_v7 = vmul.f32 %v432_v0, %v430_v62  ;;  %441 = vrsqrt.f32 %v276_v3 }
  0xb2   :  { %v772_v31 = vpop.xlane.xlu1 %150  ;;  %v63_v28 = vpop.xlane.xlu0 %62  ;;  %443 = vrsqrt.f32 %v244_v5 }
  0xb3   :  { %v317_v29 = vmul.f32 %v301_v27, %v63_v28  ;;  %v434_v6 = vpop.eup %433  ;;  %v245_v12 = vmax.f32 %v772_v31, 1e-24 }
  0xb4   :  { %v436_v8 = vpop.eup %435 }
  0xb5   :  { %v333_v32 = vadd.f32 1.0, %v317_v29  ;;  %v306_v14 = vmul.f32 %v436_v8, %v434_v6  ;;  %445 = vrsqrt.f32 %v245_v12 }
  0xb6   :  { %v66_v36 = vpop.xlane.xlu1 %65  ;;  %v774_v37 = vpop.xlane.xlu0 %214 }
  0xb7   :  { %v318_v39 = vmul.f32 %v302_v33, %v66_v36  ;;  %v349_v42 = vmul.f32 0.5, %v333_v32  ;;  %v277_v15 = vmax.f32 %v774_v37, 1e-24  ;;  %v438_v24 = vpop.eup %437 }
  0xb8   :  { %v440_v26 = vpop.eup %439 }
  0xb9   :  { %v334_v34 = vadd.f32 1.0, %v318_v39  ;;  %365 = vxpose.xlu0.b32.start [1/16] (narrow) %v349_v42, 8  ;;  %447 = vrsqrt.f32 %v277_v15  ;;  %v307_v29 = vmul.f32 %v440_v26, %v438_v24 }
  0xba   :  { %v218_v45 = vpop.xlane.xlu1 %217  ;;  %v776_v47 = vpop.xlane.xlu0 %153 }
  0xbb   :  { %v350_v40 = vmul.f32 0.5, %v334_v34  ;;  %v278_v18 = vmax.f32 %v218_v45, 1e-24  ;;  %v246_v21 = vmax.f32 %v776_v47, 1e-24  ;;  %v442_v28 = vpop.eup %441 }
  0xbc   :  { %v444_v32 = vpop.eup %443 }
  0xbd   :  { %366 = vxpose.xlu0.b32.cont [2/16] (narrow) %v350_v40, 8  ;;  %449 = vrsqrt.f32 %v278_v18  ;;  %v308_v43 = vmul.f32 %v444_v32, %v442_v28 }
  0xbe   :  { %v157_v53 = vpop.xlane.xlu1 %156  ;;  %v69_v54 = vpop.xlane.xlu0 %68  ;;  %451 = vrsqrt.f32 %v246_v21 }
  0xbf   :  { %v319_v55 = vmul.f32 %v303_v50, %v69_v54  ;;  %v247_v27 = vmax.f32 %v157_v53, 1e-24  ;;  %v446_v35 = vpop.eup %445 }
  0xc1   :  { %v335_v58 = vadd.f32 1.0, %v319_v55  ;;  %453 = vrsqrt.f32 %v247_v27 }
  0xc2   :  { %v72_v56 = vpop.xlane.xlu1 %71  ;;  %v221_v57 = vpop.xlane.xlu0 %220 }
  0xc3   :  { %v351_v51 = vmul.f32 0.5, %v335_v58  ;;  %v320_v60 = vmul.f32 %v304_v59, %v72_v56  ;;  %v279_v31 = vmax.f32 %v221_v57, 1e-24  ;;  %v448_v40 = vpop.eup %447 }
  0xc4   :  { %v309_v46 = vmul.f32 %v448_v40, %v446_v35 }
  0xc5   :  { %v336_v63 = vadd.f32 1.0, %v320_v60  ;;  %367 = vxpose.xlu0.b32.cont [3/16] (narrow) %v351_v51, 8  ;;  %455 = vrsqrt.f32 %v279_v31 }
  0xc6   :  { %v224_v1 = vpop.xlane.xlu1 %223  ;;  %v160_v2 = vpop.xlane.xlu0 %159 }
  0xc7   :  { %v352_v4 = vmul.f32 0.5, %v336_v63  ;;  %v280_v37 = vmax.f32 %v224_v1, 1e-24  ;;  %v248_v39 = vmax.f32 %v160_v2, 1e-24  ;;  %v450_v49 = vpop.eup %449 }
  0xc8   :  { %v452_v52 = vpop.eup %451 }
  0xc9   :  { %368 = vxpose.xlu0.b32.cont [4/16] (narrow) %v352_v4, 8  ;;  %457 = vrsqrt.f32 %v280_v37  ;;  %v310_v57 = vmul.f32 %v452_v52, %v450_v49 }
  0xca   :  { %v163_v9 = vpop.xlane.xlu1 %162  ;;  %v75_v10 = vpop.xlane.xlu0 %74  ;;  %459 = vrsqrt.f32 %v248_v39 }
  0xcb   :  { %v321_v11 = vmul.f32 %v305_v7, %v75_v10  ;;  %v249_v45 = vmax.f32 %v163_v9, 1e-24  ;;  %v454_v56 = vpop.eup %453 }
  0xcd   :  { %v337_v13 = vadd.f32 1.0, %v321_v11  ;;  %461 = vrsqrt.f32 %v249_v45 }
  0xce   :  { %v78_v16 = vpop.xlane.xlu1 %77  ;;  %v227_v17 = vpop.xlane.xlu0 %226 }
  0xcf   :  { %v353_v19 = vmul.f32 0.5, %v337_v13  ;;  %v322_v20 = vmul.f32 %v306_v14, %v78_v16  ;;  %v281_v41 = vmax.f32 %v227_v17, 1e-24  ;;  %v456_v51 = vpop.eup %455 }
  0xd0   :  { %v311_v5 = vmul.f32 %v456_v51, %v454_v56 }
  0xd1   :  { %v338_v25 = vadd.f32 1.0, %v322_v20  ;;  %369 = vxpose.xlu0.b32.cont [5/16] (narrow) %v353_v19, 8  ;;  %463 = vrsqrt.f32 %v281_v41 }
  0xd2   :  { %v230_v22 = vpop.xlane.xlu1 %229  ;;  %v166_v23 = vpop.xlane.xlu0 %165 }
  0xd3   :  { %v354_v30 = vmul.f32 0.5, %v338_v25  ;;  %v282_v55 = vmax.f32 %v230_v22, 1e-24  ;;  %v250_v59 = vmax.f32 %v166_v23, 1e-24  ;;  %v458_v2 = vpop.eup %457 }
  0xd4   :  { %v460_v6 = vpop.eup %459 }
  0xd5   :  { %370 = vxpose.xlu0.b32.cont [6/16] (narrow) %v354_v30, 8  ;;  %465 = vrsqrt.f32 %v282_v55  ;;  %v312_v14 = vmul.f32 %v460_v6, %v458_v2 }
  0xd6   :  { %v169_v33 = vpop.xlane.xlu1 %168  ;;  %v81_v36 = vpop.xlane.xlu0 %80  ;;  %467 = vrsqrt.f32 %v250_v59 }
  0xd7   :  { %v323_v38 = vmul.f32 %v307_v29, %v81_v36  ;;  %v251_v62 = vmax.f32 %v169_v33, 1e-24  ;;  %v462_v13 = vpop.eup %461 }
  0xd9   :  { %v339_v42 = vadd.f32 1.0, %v323_v38  ;;  %469 = vrsqrt.f32 %v251_v62 }
  0xda   :  { %v84_v44 = vpop.xlane.xlu1 %83  ;;  %v233_v34 = vpop.xlane.xlu0 %232 }
  0xdb   :  { %v355_v47 = vmul.f32 0.5, %v339_v42  ;;  %v324_v48 = vmul.f32 %v308_v43, %v84_v44  ;;  %v283_v1 = vmax.f32 %v233_v34, 1e-24  ;;  %v464_v15 = vpop.eup %463 }
  0xdc   :  { %v313_v21 = vmul.f32 %v464_v15, %v462_v13 }
  0xdd   :  { %v340_v50 = vadd.f32 1.0, %v324_v48  ;;  %371 = vxpose.xlu0.b32.cont [7/16] (narrow) %v355_v47, 8  ;;  %471 = vrsqrt.f32 %v283_v1 }
  0xde   :  { %v236_v53 = vpop.xlane.xlu1 %235  ;;  %v172_v54 = vpop.xlane.xlu0 %171 }
  0xdf   :  { %v356_v58 = vmul.f32 0.5, %v340_v50  ;;  %v284_v3 = vmax.f32 %v236_v53, 1e-24  ;;  %v252_v7 = vmax.f32 %v172_v54, 1e-24  ;;  %v466_v20 = vpop.eup %465 }
  0xe0   :  { %v468_v24 = vpop.eup %467 }
  0xe1   :  { %372 = vxpose.xlu0.b32.cont [8/16] (narrow) %v356_v58, 8  ;;  %473 = vrsqrt.f32 %v284_v3  ;;  %v314_v30 = vmul.f32 %v468_v24, %v466_v20 }
  0xe2   :  { %v90_v60 = vpop.xlane.xlu1 %89  ;;  %v87_v61 = vpop.xlane.xlu0 %86  ;;  %475 = vrsqrt.f32 %v252_v7 }
  0xe3   :  { %v326_v63 = vmul.f32 %v310_v57, %v90_v60  ;;  %v325_v0 = vmul.f32 %v309_v46, %v87_v61  ;;  %v470_v27 = vpop.eup %469 }
  0xe5   :  { %v341_v4 = vadd.f32 1.0, %v325_v0  ;;  %v342_v9 = vadd.f32 1.0, %v326_v63 }
  0xe6   :  { %v93_v8 = vpop.xlane.xlu0 %92  ;;  %v96_v12 = vpop.xlane.xlu1 %95 }
  0xe7   :  { %v357_v10 = vmul.f32 0.5, %v341_v4  ;;  %v327_v11 = vmul.f32 %v311_v5, %v93_v8  ;;  %v358_v16 = vmul.f32 0.5, %v342_v9  ;;  %v328_v17 = vmul.f32 %v312_v14, %v96_v12  ;;  %v472_v31 = vpop.eup %471 }
  0xe8   :  { %v315_v38 = vmul.f32 %v472_v31, %v470_v27 }
  0xe9   :  { %373 = vxpose.xlu0.b32.cont [9/16] (narrow) %v357_v10, 8  ;;  %v343_v18 = vadd.f32 1.0, %v327_v11  ;;  %v344_v25 = vadd.f32 1.0, %v328_v17 }
  0xea   :  { %v99_v19 = vpop.xlane.xlu0 %98  ;;  %v102_v23 = vpop.xlane.xlu1 %101 }
  0xeb   :  { %v359_v26 = vmul.f32 0.5, %v343_v18  ;;  %v329_v22 = vmul.f32 %v313_v21, %v99_v19  ;;  %v474_v28 = vpop.eup %473  ;;  %v360_v29 = vmul.f32 0.5, %v344_v25  ;;  %v330_v32 = vmul.f32 %v314_v30, %v102_v23 }
  0xec   :  { %v476_v36 = vpop.eup %475 }
  0xed   :  { %374 = vxpose.xlu0.b32.cont [10/16] (narrow) %v358_v16, 8  ;;  %v345_v33 = vadd.f32 1.0, %v329_v22  ;;  %v346_v39 = vadd.f32 1.0, %v330_v32  ;;  %v316_v43 = vmul.f32 %v476_v36, %v474_v28 }
  0xee   :  { %v105_v37 = vpop.xlane.xlu0 %104  ;;  %v108_v34 = vpop.xlane.xlu1 %107 }
  0xef   :  { %v361_v42 = vmul.f32 0.5, %v345_v33  ;;  %v331_v44 = vmul.f32 %v315_v38, %v105_v37  ;;  %v362_v35 = vmul.f32 0.5, %v346_v39  ;;  %v332_v45 = vmul.f32 %v316_v43, %v108_v34 }
  0xf1   :  { %375 = vxpose.xlu0.b32.cont [11/16] (narrow) %v359_v26, 8  ;;  %v347_v47 = vadd.f32 1.0, %v331_v44  ;;  %v348_v48 = vadd.f32 1.0, %v332_v45 }
  0xf3   :  { %v363_v40 = vmul.f32 0.5, %v347_v47  ;;  %v364_v41 = vmul.f32 0.5, %v348_v48 }
  0xf5   :  { %376 = vxpose.xlu0.b32.cont [12/16] (narrow) %v360_v29, 8 }
  0xf9   :  { %377 = vxpose.xlu0.b32.cont [13/16] (narrow) %v361_v42, 8 }
  0xfd   :  { %378 = vxpose.xlu0.b32.cont [14/16] (narrow) %v362_v35, 8 }
 0x101   :  { %379 = vxpose.xlu0.b32.cont [15/16] (narrow) %v363_v40, 8 }
 0x105   :  { %380 = vxpose.xlu0.b32.end [16/16] (narrow) %v364_v41, 8 }
 0x149   :  { %v381_v49 = vpop.trf.xlu0 }
 0x14a   :  { %397 = vst [vmem:[#allocation2] sm:$0x1] %v381_v49 }
 0x14b   :  { %488 = shalt.err (!%p485_p4)
}
 0x14c   :  { %s489_s21 = scalar_lea.hbm %s798_s2, 16 }
 0x14d   :  { %p490_p5 = scmp.ne.s32.totalorder %s798_s2, %s489_s21  ;;  %p493_p6 = scmp.lt.u32.totalorder %s489_s21, %s798_s2 }
 0x14f   :  { %p495_p7 = pnand %p493_p6, %p490_p5 }
 0x151   :  { %498 = shalt.err (!%p495_p7)
}
 0x152   :  { %407 = dma.vmem_to_hbm [thread:$0]  %s405_s1, 16, %s798_s2, [#allocation3]  }
 0x153   :  { %499 = dma.done.wait [#allocation3], 16  }
 0x154   :  { %500 = vsyncadd [#allocation3], 4294967280 }
 0x155   :  { %411 = vsyncpa [#allocation3], 1 }

</bundles_post_ra>
